<compile_context>
chip_gen: v5e
topology: v5e:2x2
jax: 0.10.0
libtpu: 0.0.40
codegen_flags: <defaults>
</compile_context>

<pallas_src>
import jax
import jax.numpy as jnp
from jax.experimental import pallas as pl
from jax.experimental.pallas import tpu as pltpu


def _round_up(n, m):
    return (n + m - 1) // m * m


def _ae_fused_kernel(x_ref,
                     we0_ref, be0_ref, we1_ref, be1_ref,
                     wd0_ref, bd0_ref, wd1_ref, bd1_ref,
                     out_ref, zeta_ref):
    """Fused MLP autoencoder forward for one (TB, D) batch tile.

    bf16 MXU operands, f32 accumulation, f32 bias/ReLU/sigmoid epilogues,
    bf16 store of the reconstruction.
    """
    # Cast to bf16 in-kernel (input stream stays f32 in HBM; no wrapper pass).
    x = x_ref[...].astype(jnp.bfloat16)                        # (TB, D)

    # ---- encoder ----
    h = jnp.dot(x, we0_ref[...], preferred_element_type=jnp.float32)
    h = jnp.maximum(h + be0_ref[...], 0.0)                     # ReLU (f32)

    z = jnp.dot(h.astype(jnp.bfloat16), we1_ref[...],
                preferred_element_type=jnp.float32)
    z = jnp.maximum(z + be1_ref[...], 0.0)                     # ReLU (f32)
    zeta_ref[...] = z                                          # latent output (f32)

    # ---- decoder ----
    g = jnp.dot(z.astype(jnp.bfloat16), wd0_ref[...],
                preferred_element_type=jnp.float32)
    g = jnp.maximum(g + bd0_ref[...], 0.0)                     # ReLU (f32)

    o = jnp.dot(g.astype(jnp.bfloat16), wd1_ref[...],
                preferred_element_type=jnp.float32)
    o = o + bd1_ref[...]
    # sigmoid(x) == 0.5 * (tanh(0.5*x) + 1): one EUP tanh per element (f32),
    # stored as bf16 (halves the dominant HBM output stream).
    out_ref[...] = (0.5 * (jnp.tanh(0.5 * o) + 1.0)).astype(out_ref.dtype)


def prepare_params(params):
    """One-time conversion of the Linear weights to bf16 (MXU operands).

    Call this once when loading/initializing the model, NOT per forward call.
    Biases stay f32 (they feed the f32 epilogue)."""
    (we0, be0), (we1, be1), (wd0, bd0), (wd1, bd1) = params
    return ((we0.astype(jnp.bfloat16), be0),
            (we1.astype(jnp.bfloat16), be1),
            (wd0.astype(jnp.bfloat16), bd0),
            (wd1.astype(jnp.bfloat16), bd1))


def autoencoder_forward(x_nchw, prepared_params, *, block_b=512):
    """Flatten NCHW input, tile the batch, run the fused Pallas kernel.

    Returns (output_data, zeta) like AutoEncoder.forward; output_data is bf16
    (sigmoid output), zeta is f32.
    """
    B = x_nchw.shape[0]
    D = int(x_nchw.shape[1] * x_nchw.shape[2] * x_nchw.shape[3])
    x_flat = x_nchw.reshape(B, D)                              # free view/reshape

    (we0, be0), (we1, be1), (wd0, bd0), (wd1, bd1) = prepared_params
    enc_hidden = we0.shape[1]
    latent = we1.shape[1]
    dec_hidden = wd0.shape[1]

    # Batch tile: keep >=2 grid steps when the batch allows it (v7x megacore),
    # multiple of 8 sublanes, capped at block_b. No padding: Pallas masks the
    # ragged last block (per-row compute is independent, OOB writes dropped).
    if B <= 8:
        TB = B                         # block == full batch dim: always legal
    else:
        TB = min(block_b, _round_up(pl.cdiv(B, 2), 8))
    grid = (pl.cdiv(B, TB),)

    weight_elems = (D * enc_hidden + enc_hidden * latent
                    + latent * dec_hidden + dec_hidden * D)
    bias_elems = enc_hidden + latent + dec_hidden + D
    x_itemsize = x_flat.dtype.itemsize

    cost = pl.CostEstimate(
        flops=2 * B * weight_elems,
        transcendentals=B * D,                                 # sigmoid/tanh
        bytes_accessed=(B * D * x_itemsize                     # x (native dtype)
                        + B * D * 2                            # out (bf16)
                        + B * latent * 4                       # zeta (f32)
                        + 2 * weight_elems                     # weights (bf16)
                        + 4 * bias_elems),                     # biases (f32)
    )

    # Explicit scoped-VMEM budget: double-buffered x/out/zeta tiles + resident
    # weights, with slack. Keeps larger block_b safe on v5e's 16 MiB default.
    tile_bytes = TB * D * x_itemsize + TB * D * 2 + TB * latent * 4
    wb_bytes = 2 * weight_elems + 4 * bias_elems
    vmem_limit = min(64 << 20, max(16 << 20, 2 * tile_bytes + 2 * wb_bytes + (2 << 20)))

    # Weights/biases: same block every grid step -> DMA'd once, VMEM-resident.
    resident = lambda shape: pl.BlockSpec(shape, lambda i: (0, 0))

    out, zeta = pl.pallas_call(
        _ae_fused_kernel,
        out_shape=(
            jax.ShapeDtypeStruct((B, D), jnp.bfloat16),        # output_data
            jax.ShapeDtypeStruct((B, latent), jnp.float32),    # zeta
        ),
        grid=grid,
        in_specs=[
            pl.BlockSpec((TB, D), lambda i: (i, 0)),           # x batch tile
            resident((D, enc_hidden)), resident((1, enc_hidden)),      # we0, be0
            resident((enc_hidden, latent)), resident((1, latent)),     # we1, be1
            resident((latent, dec_hidden)), resident((1, dec_hidden)), # wd0, bd0
            resident((dec_hidden, D)), resident((1, D)),               # wd1, bd1
        ],
        out_specs=(
            pl.BlockSpec((TB, D), lambda i: (i, 0)),           # output tile
            pl.BlockSpec((TB, latent), lambda i: (i, 0)),      # zeta tile
        ),
        compiler_params=pltpu.CompilerParams(
            dimension_semantics=("parallel",),                 # megacore on v7x
            vmem_limit_bytes=vmem_limit),
        cost_estimate=cost,
    )(x_flat, we0, be0, we1, be1, wd0, bd0, wd1, bd1)

    return out, zeta


def init_params(key, input_dim, enc_hidden, latent, dec_hidden):
    """Deterministic PyTorch-Linear-style init: U(-1/sqrt(fan_in), 1/sqrt(fan_in)).

    Weights stored as (in, out), all f32."""
    dims = [
        (input_dim, enc_hidden),   # encoder layer 0
        (enc_hidden, latent),      # encoder layer 1 (to latent)
        (latent, dec_hidden),      # decoder layer 0
        (dec_hidden, input_dim),   # decoder layer 1 (to output)
    ]
    params = []
    for (fan_in, fan_out) in dims:
        key, kw, kb = jax.random.split(key, 3)
        bound = 1.0 / (fan_in ** 0.5)
        W = jax.random.uniform(kw, (fan_in, fan_out), jnp.float32, -bound, bound)
        b = jax.random.uniform(kb, (1, fan_out), jnp.float32, -bound, bound)
        params.append((W, b))
    return params


if __name__ == "__main__":
    key = jax.random.PRNGKey(0)

    # Shapes implied by the module: image-like input flattened to input_dim.
    B, C, H, W = 2, 4, 16, 16           # NCHW input
    input_dim = C * H * W               # 1024
    enc_hidden = 32                     # config.encoder_hidden_nodes = [32]
    latent = 8                          # config.model.n_latent_nodes
    dec_hidden = 32                     # config.model.decoder_hidden_nodes = [32]

    key, kx, kp = jax.random.split(key, 3)
    x = jax.random.uniform(kx, (B, C, H, W), jnp.float32)   # data in [0,1)
    params = init_params(kp, input_dim, enc_hidden, latent, dec_hidden)
    prepared = prepare_params(params)   # one-time bf16 weight conversion

    out, zeta = autoencoder_forward(x, prepared)
    jax.block_until_ready((out, zeta))
    assert out.shape == (B, input_dim) and zeta.shape == (B, latent)
    assert out.dtype == jnp.bfloat16 and zeta.dtype == jnp.float32

    (we0, be0), (we1, be1), (wd0, bd0), (wd1, bd1) = params
    xf = x.reshape(B, input_dim)

    # bf16-consistent pure-JAX reference (same math as the kernel).
    def dot_bf16(a, w):
        return jnp.dot(a.astype(jnp.bfloat16), w.astype(jnp.bfloat16),
                       preferred_element_type=jnp.float32)

    h_ref = jnp.maximum(dot_bf16(xf, we0) + be0, 0.0)
    z_ref = jnp.maximum(dot_bf16(h_ref, we1) + be1, 0.0)
    g_ref = jnp.maximum(dot_bf16(z_ref, wd0) + bd0, 0.0)
    o_ref = jax.nn.sigmoid(dot_bf16(g_ref, wd1) + bd1)
    # out is bf16 (sigmoid in [0,1]; bf16 rel. precision ~4e-3).
    assert jnp.allclose(out.astype(jnp.float32), o_ref, atol=1e-2), "output mismatch"
    assert jnp.allclose(zeta, z_ref, atol=2e-3, rtol=2e-3), "zeta mismatch"

    # Fidelity sanity check against the full-f32 (PyTorch-equivalent) math;
    # tolerance loosened because matmul operands / stored output are bf16.
    h32 = jnp.maximum(xf @ we0 + be0, 0.0)
    z32 = jnp.maximum(h32 @ we1 + be1, 0.0)
    g32 = jnp.maximum(z32 @ wd0 + bd0, 0.0)
    o32 = jax.nn.sigmoid(g32 @ wd1 + bd1)
    assert jnp.allclose(out.astype(jnp.float32), o32, atol=1e-1), "output far from f32 reference"
    assert jnp.allclose(zeta, z32, atol=1e-1), "zeta far from f32 reference"

    print("KERNEL_OK")
</pallas_src>

<mosaic_0001>
module attributes {stable_mosaic.version = 11 : i64} {
  func.func @_ae_fused_kernel(%arg0: i32, %arg1: memref<2x1024xf32, #tpu.memory_space<vmem>>, %arg2: memref<1024x32xbf16, #tpu.memory_space<vmem>>, %arg3: memref<1x32xf32, #tpu.memory_space<vmem>>, %arg4: memref<32x8xbf16, #tpu.memory_space<vmem>>, %arg5: memref<1x8xf32, #tpu.memory_space<vmem>>, %arg6: memref<8x32xbf16, #tpu.memory_space<vmem>>, %arg7: memref<1x32xf32, #tpu.memory_space<vmem>>, %arg8: memref<32x1024xbf16, #tpu.memory_space<vmem>>, %arg9: memref<1x1024xf32, #tpu.memory_space<vmem>>, %arg10: memref<2x1024xbf16, #tpu.memory_space<vmem>>, %arg11: memref<2x8xf32, #tpu.memory_space<vmem>>) attributes {dimension_semantics = [#tpu.dimension_semantics<parallel>], iteration_bounds = array<i64: 1>, scalar_prefetch = 0 : i64, scratch_operands = 0 : i64, tpu.core_type = #tpu.core_type<tc>, window_params = [{transform_indices = @transform_0, window_bounds = array<i64: 2, 1024>}, {pipeline_mode = #tpu.pipeline_mode<synchronous>, transform_indices = @transform_1, window_bounds = array<i64: 1024, 32>}, {pipeline_mode = #tpu.pipeline_mode<synchronous>, transform_indices = @transform_2, window_bounds = array<i64: 1, 32>}, {pipeline_mode = #tpu.pipeline_mode<synchronous>, transform_indices = @transform_3, window_bounds = array<i64: 32, 8>}, {pipeline_mode = #tpu.pipeline_mode<synchronous>, transform_indices = @transform_4, window_bounds = array<i64: 1, 8>}, {pipeline_mode = #tpu.pipeline_mode<synchronous>, transform_indices = @transform_5, window_bounds = array<i64: 8, 32>}, {pipeline_mode = #tpu.pipeline_mode<synchronous>, transform_indices = @transform_6, window_bounds = array<i64: 1, 32>}, {pipeline_mode = #tpu.pipeline_mode<synchronous>, transform_indices = @transform_7, window_bounds = array<i64: 32, 1024>}, {pipeline_mode = #tpu.pipeline_mode<synchronous>, transform_indices = @transform_8, window_bounds = array<i64: 1, 1024>}, {transform_indices = @transform_9, window_bounds = array<i64: 2, 1024>}, {transform_indices = @transform_10, window_bounds = array<i64: 2, 8>}]} {
    %c0 = arith.constant 0 : index
    %c0_0 = arith.constant 0 : index
    %0 = vector.load %arg1[%c0, %c0_0] : memref<2x1024xf32, #tpu.memory_space<vmem>>, vector<2x1024xf32>
    %1 = arith.truncf %0 : vector<2x1024xf32> to vector<2x1024xbf16>
    %c0_1 = arith.constant 0 : index
    %c0_2 = arith.constant 0 : index
    %2 = vector.load %arg2[%c0_1, %c0_2] : memref<1024x32xbf16, #tpu.memory_space<vmem>>, vector<1024x32xbf16>
    %cst = arith.constant dense<0.000000e+00> : vector<2x32xf32>
    %3 = tpu.matmul %1, %2, %cst {dimension_numbers = #tpu.dot_dimension_numbers<[1], [0], [0], [1], [0, 0, 1, 1], [], []>} : vector<2x1024xbf16>, vector<1024x32xbf16>, vector<2x32xf32> -> vector<2x32xf32>
    %c0_3 = arith.constant 0 : index
    %c0_4 = arith.constant 0 : index
    %4 = vector.load %arg3[%c0_3, %c0_4] : memref<1x32xf32, #tpu.memory_space<vmem>>, vector<1x32xf32>
    %5 = vector.broadcast %4 : vector<1x32xf32> to vector<2x32xf32>
    %6 = arith.addf %3, %5 : vector<2x32xf32>
    %cst_5 = arith.constant 0.000000e+00 : f32
    %7 = vector.broadcast %cst_5 : f32 to vector<2x32xf32>
    %8 = arith.maximumf %6, %7 : vector<2x32xf32>
    %9 = arith.truncf %8 : vector<2x32xf32> to vector<2x32xbf16>
    %c0_6 = arith.constant 0 : index
    %c0_7 = arith.constant 0 : index
    %10 = vector.load %arg4[%c0_6, %c0_7] : memref<32x8xbf16, #tpu.memory_space<vmem>>, vector<32x8xbf16>
    %cst_8 = arith.constant dense<0.000000e+00> : vector<2x8xf32>
    %11 = tpu.matmul %9, %10, %cst_8 {dimension_numbers = #tpu.dot_dimension_numbers<[1], [0], [0], [1], [0, 0, 1, 1], [], []>} : vector<2x32xbf16>, vector<32x8xbf16>, vector<2x8xf32> -> vector<2x8xf32>
    %c0_9 = arith.constant 0 : index
    %c0_10 = arith.constant 0 : index
    %12 = vector.load %arg5[%c0_9, %c0_10] : memref<1x8xf32, #tpu.memory_space<vmem>>, vector<1x8xf32>
    %13 = vector.broadcast %12 : vector<1x8xf32> to vector<2x8xf32>
    %14 = arith.addf %11, %13 : vector<2x8xf32>
    %cst_11 = arith.constant 0.000000e+00 : f32
    %15 = vector.broadcast %cst_11 : f32 to vector<2x8xf32>
    %16 = arith.maximumf %14, %15 : vector<2x8xf32>
    %c0_12 = arith.constant 0 : index
    %c0_13 = arith.constant 0 : index
    %17 = vector.load %arg11[%c0_12, %c0_13] : memref<2x8xf32, #tpu.memory_space<vmem>>, vector<2x8xf32>
    tpu.vector_store %arg11[%c0_12, %c0_13], %16 {strides = array<i32>} : memref<2x8xf32, #tpu.memory_space<vmem>>, vector<2x8xf32>,
    %18 = arith.truncf %16 : vector<2x8xf32> to vector<2x8xbf16>
    %c0_14 = arith.constant 0 : index
    %c0_15 = arith.constant 0 : index
    %19 = vector.load %arg6[%c0_14, %c0_15] : memref<8x32xbf16, #tpu.memory_space<vmem>>, vector<8x32xbf16>
    %cst_16 = arith.constant dense<0.000000e+00> : vector<2x32xf32>
    %20 = tpu.matmul %18, %19, %cst_16 {dimension_numbers = #tpu.dot_dimension_numbers<[1], [0], [0], [1], [0, 0, 1, 1], [], []>} : vector<2x8xbf16>, vector<8x32xbf16>, vector<2x32xf32> -> vector<2x32xf32>
    %c0_17 = arith.constant 0 : index
    %c0_18 = arith.constant 0 : index
    %21 = vector.load %arg7[%c0_17, %c0_18] : memref<1x32xf32, #tpu.memory_space<vmem>>, vector<1x32xf32>
    %22 = vector.broadcast %21 : vector<1x32xf32> to vector<2x32xf32>
    %23 = arith.addf %20, %22 : vector<2x32xf32>
    %cst_19 = arith.constant 0.000000e+00 : f32
    %24 = vector.broadcast %cst_19 : f32 to vector<2x32xf32>
    %25 = arith.maximumf %23, %24 : vector<2x32xf32>
    %26 = arith.truncf %25 : vector<2x32xf32> to vector<2x32xbf16>
    %c0_20 = arith.constant 0 : index
    %c0_21 = arith.constant 0 : index
    %27 = vector.load %arg8[%c0_20, %c0_21] : memref<32x1024xbf16, #tpu.memory_space<vmem>>, vector<32x1024xbf16>
    %cst_22 = arith.constant dense<0.000000e+00> : vector<2x1024xf32>
    %28 = tpu.matmul %26, %27, %cst_22 {dimension_numbers = #tpu.dot_dimension_numbers<[1], [0], [0], [1], [0, 0, 1, 1], [], []>} : vector<2x32xbf16>, vector<32x1024xbf16>, vector<2x1024xf32> -> vector<2x1024xf32>
    %c0_23 = arith.constant 0 : index
    %c0_24 = arith.constant 0 : index
    %29 = vector.load %arg9[%c0_23, %c0_24] : memref<1x1024xf32, #tpu.memory_space<vmem>>, vector<1x1024xf32>
    %30 = vector.broadcast %29 : vector<1x1024xf32> to vector<2x1024xf32>
    %31 = arith.addf %28, %30 : vector<2x1024xf32>
    %cst_25 = arith.constant 5.000000e-01 : f32
    %32 = vector.broadcast %cst_25 : f32 to vector<2x1024xf32>
    %33 = arith.mulf %32, %31 : vector<2x1024xf32>
    %34 = math.tanh %33 : vector<2x1024xf32>
    %cst_26 = arith.constant 1.000000e+00 : f32
    %35 = vector.broadcast %cst_26 : f32 to vector<2x1024xf32>
    %36 = arith.addf %34, %35 : vector<2x1024xf32>
    %cst_27 = arith.constant 5.000000e-01 : f32
    %37 = vector.broadcast %cst_27 : f32 to vector<2x1024xf32>
    %38 = arith.mulf %37, %36 : vector<2x1024xf32>
    %39 = arith.truncf %38 : vector<2x1024xf32> to vector<2x1024xbf16>
    %c0_28 = arith.constant 0 : index
    %c0_29 = arith.constant 0 : index
    %40 = vector.load %arg10[%c0_28, %c0_29] : memref<2x1024xbf16, #tpu.memory_space<vmem>>, vector<2x1024xbf16>
    tpu.vector_store %arg10[%c0_28, %c0_29], %39 {strides = array<i32>} : memref<2x1024xbf16, #tpu.memory_space<vmem>>, vector<2x1024xbf16>,
    return
  }
  func.func @transform_0(%arg0: i32) -> (i32, i32) {
    %c0_i32 = arith.constant 0 : i32
    %c0_i32_0 = arith.constant 0 : i32
    return %arg0, %c0_i32 : i32, i32
  }
  func.func @transform_1(%arg0: i32) -> (i32, i32) {
    %c0_i32 = arith.constant 0 : i32
    %c0_i32_0 = arith.constant 0 : i32
    %c0_i32_1 = arith.constant 0 : i32
    return %c0_i32, %c0_i32_0 : i32, i32
  }
  func.func @transform_2(%arg0: i32) -> (i32, i32) {
    %c0_i32 = arith.constant 0 : i32
    %c0_i32_0 = arith.constant 0 : i32
    %c0_i32_1 = arith.constant 0 : i32
    return %c0_i32, %c0_i32_0 : i32, i32
  }
  func.func @transform_3(%arg0: i32) -> (i32, i32) {
    %c0_i32 = arith.constant 0 : i32
    %c0_i32_0 = arith.constant 0 : i32
    %c0_i32_1 = arith.constant 0 : i32
    return %c0_i32, %c0_i32_0 : i32, i32
  }
  func.func @transform_4(%arg0: i32) -> (i32, i32) {
    %c0_i32 = arith.constant 0 : i32
    %c0_i32_0 = arith.constant 0 : i32
    %c0_i32_1 = arith.constant 0 : i32
    return %c0_i32, %c0_i32_0 : i32, i32
  }
  func.func @transform_5(%arg0: i32) -> (i32, i32) {
    %c0_i32 = arith.constant 0 : i32
    %c0_i32_0 = arith.constant 0 : i32
    %c0_i32_1 = arith.constant 0 : i32
    return %c0_i32, %c0_i32_0 : i32, i32
  }
  func.func @transform_6(%arg0: i32) -> (i32, i32) {
    %c0_i32 = arith.constant 0 : i32
    %c0_i32_0 = arith.constant 0 : i32
    %c0_i32_1 = arith.constant 0 : i32
    return %c0_i32, %c0_i32_0 : i32, i32
  }
  func.func @transform_7(%arg0: i32) -> (i32, i32) {
    %c0_i32 = arith.constant 0 : i32
    %c0_i32_0 = arith.constant 0 : i32
    %c0_i32_1 = arith.constant 0 : i32
    return %c0_i32, %c0_i32_0 : i32, i32
  }
  func.func @transform_8(%arg0: i32) -> (i32, i32) {
    %c0_i32 = arith.constant 0 : i32
    %c0_i32_0 = arith.constant 0 : i32
    %c0_i32_1 = arith.constant 0 : i32
    return %c0_i32, %c0_i32_0 : i32, i32
  }
  func.func @transform_9(%arg0: i32) -> (i32, i32) {
    %c0_i32 = arith.constant 0 : i32
    %c0_i32_0 = arith.constant 0 : i32
    return %arg0, %c0_i32 : i32, i32
  }
  func.func @transform_10(%arg0: i32) -> (i32, i32) {
    %c0_i32 = arith.constant 0 : i32
    %c0_i32_0 = arith.constant 0 : i32
    return %arg0, %c0_i32 : i32, i32
  }
}

</mosaic_0001>

<bundles_post_ra>
// kernel: tpu_custom_call.1
= control target key start
LH: loop header
LB: loop body
LE: loop exit
PB: predicated region body
PF: predicated region fallthrough
CT: control target
= control target key end

     0   :  { %16 = vsyncpa [#allocation3], 0  ;;  %s1964_s0 = inlined_call_operand.vmem [shape: f32[2,1024], index: 0, kind: input, shape index: {}]   ;;  %s1965_s1 = inlined_call_operand.vmem [shape: bf16[1024,32], index: 1, kind: input, shape index: {}]   ;;  %s1966_s2 = inlined_call_operand.vmem [shape: f32[1,32], index: 2, kind: input, shape index: {}]   ;;  %s1967_s3 = inlined_call_operand.vmem [shape: bf16[32,8], index: 3, kind: input, shape index: {}]   ;;  %s1968_s4 = inlined_call_operand.vmem [shape: f32[1,8], index: 4, kind: input, shape index: {}]   ;;  %s1969_s5 = inlined_call_operand.vmem [shape: bf16[8,32], index: 5, kind: input, shape index: {}]   ;;  %s1970_s6 = inlined_call_operand.vmem [shape: f32[1,32], index: 6, kind: input, shape index: {}]   ;;  %s1971_s7 = inlined_call_operand.vmem [shape: bf16[32,1024], index: 7, kind: input, shape index: {}]   ;;  %s1972_s8 = inlined_call_operand.vmem [shape: f32[1,1024], index: 8, kind: input, shape index: {}]   ;;  %s1973_s9 = inlined_call_operand.hbm [shape: bf16[2,1024], index: 9, kind: output, shape index: {0}]   ;;  %s1974_s10 = inlined_call_operand.hbm [shape: f32[2,8], index: 10, kind: output, shape index: {1}]  }
   0x1   :  { %v1427_v0 = vld [vmem:[%s1965_s1 + $0x38] sm:$0xff]  ;;  %v1426_v4 = vld [vmem:[%s1965_s1 + $0x30] sm:$0xff]  ;;  %v1425_v8 = vld [vmem:[%s1965_s1 + $0x28] sm:$0xff] }
   0x2   :  { %v1435_v1 = vld [vmem:[%s1965_s1 + $0x78] sm:$0xff]  ;;  %584 = vmatpush.bf16.msra.mxu0 %v1427_v0  ;;  %v1434_v5 = vld [vmem:[%s1965_s1 + $0x70] sm:$0xff]  ;;  %v1433_v9 = vld [vmem:[%s1965_s1 + $0x68] sm:$0xff] }
   0x3   :  { %v1443_v2 = vld [vmem:[%s1965_s1 + $0xb8] sm:$0xff]  ;;  %597 = vmatpush.bf16.msra.mxu1 %v1435_v1  ;;  %v1442_v6 = vld [vmem:[%s1965_s1 + $0xb0] sm:$0xff]  ;;  %v1441_v10 = vld [vmem:[%s1965_s1 + $0xa8] sm:$0xff] }
   0x4   :  { %v1451_v3 = vld [vmem:[%s1965_s1 + $0xf8] sm:$0xff]  ;;  %610 = vmatpush.bf16.msra.mxu2 %v1443_v2  ;;  %v1450_v7 = vld [vmem:[%s1965_s1 + $0xf0] sm:$0xff]  ;;  %v1449_v11 = vld [vmem:[%s1965_s1 + $0xe8] sm:$0xff] }
   0x5   :  { %623 = vmatpush.bf16.msra.mxu3 %v1451_v3  ;;  %v1424_v12 = vld [vmem:[%s1965_s1 + $0x20] sm:$0xff]  ;;  %v1423_v17 = vld [vmem:[%s1965_s1 + $0x18] sm:$0xff]  ;;  %v1422_v21 = vld [vmem:[%s1965_s1 + $0x10] sm:$0xff] }
   0x6   :  { %585 = vmatpush.bf16.msra.mxu0 %v1426_v4  ;;  %v1432_v13 = vld [vmem:[%s1965_s1 + $0x60] sm:$0xff]  ;;  %v1431_v18 = vld [vmem:[%s1965_s1 + $0x58] sm:$0xff]  ;;  %v1430_v22 = vld [vmem:[%s1965_s1 + $0x50] sm:$0xff] }
   0x7   :  { %598 = vmatpush.bf16.msra.mxu1 %v1434_v5  ;;  %v1440_v14 = vld [vmem:[%s1965_s1 + $0xa0] sm:$0xff]  ;;  %v1439_v19 = vld [vmem:[%s1965_s1 + $0x98] sm:$0xff]  ;;  %v1438_v23 = vld [vmem:[%s1965_s1 + $0x90] sm:$0xff] }
   0x8   :  { %611 = vmatpush.bf16.msra.mxu2 %v1442_v6  ;;  %v1448_v15 = vld [vmem:[%s1965_s1 + $0xe0] sm:$0xff]  ;;  %v1447_v20 = vld [vmem:[%s1965_s1 + $0xd8] sm:$0xff]  ;;  %v1446_v24 = vld [vmem:[%s1965_s1 + $0xd0] sm:$0xff] }
   0x9   :  { %624 = vmatpush.bf16.msra.mxu3 %v1450_v7  ;;  %v37_v16 = vld [vmem:[%s1964_s0] sm:$0xff] }
   0xa   :  { %586 = vmatpush.bf16.msra.mxu0 %v1425_v8  ;;  %41 = vst [vmem:[#allocation1] ss:$4 sm:$0xff] %v37_v16 }
   0xb   :  { %599 = vmatpush.bf16.msra.mxu1 %v1433_v9 }
   0xc   :  { %612 = vmatpush.bf16.msra.mxu2 %v1441_v10 }
   0xd   :  { %625 = vmatpush.bf16.msra.mxu3 %v1449_v11 }
   0xe   :  { %587 = vmatpush.bf16.msra.mxu0 %v1424_v12 }
   0xf   :  { %600 = vmatpush.bf16.msra.mxu1 %v1432_v13 }
  0x10   :  { %613 = vmatpush.bf16.msra.mxu2 %v1440_v14 }
  0x11   :  { %626 = vmatpush.bf16.msra.mxu3 %v1448_v15 }
  0x12   :  { %588 = vmatpush.bf16.msra.mxu0 %v1423_v17 }
  0x13   :  { %601 = vmatpush.bf16.msra.mxu1 %v1431_v18 }
  0x14   :  { %614 = vmatpush.bf16.msra.mxu2 %v1439_v19 }
  0x15   :  { %627 = vmatpush.bf16.msra.mxu3 %v1447_v20 }
  0x16   :  { %17 = vsyncpa [#allocation5], 0  ;;  %589 = vmatpush.bf16.msra.mxu0 %v1422_v21  ;;  %v1421_v25 = vld [vmem:[%s1965_s1 + $0x8] sm:$0xff]  ;;  %v1420_v30 = vld [vmem:[%s1965_s1] sm:$0xff]  ;;  %vm740_vm0 = vcmask 1043456   ;;  %vm710_vm1 = vcmask 261120  }
  0x17   :  { %602 = vmatpush.bf16.msra.mxu1 %v1430_v22  ;;  %v1429_v26 = vld [vmem:[%s1965_s1 + $0x48] sm:$0xff]  ;;  %v1428_v31 = vld [vmem:[%s1965_s1 + $0x40] sm:$0xff]  ;;  %v1459_v34 = vld [vmem:[%s1965_s1 + $0x138] sm:$0xff]  ;;  %vm728_vm2 = vcmask 58368   ;;  %vm736_vm3 = vcmask 64512   ;;  %s1068_s21 = sshll.u32 %s1974_s10, 4  ;;  %s1069_s21 = int_to_ptr.hbm [resolvable:$true] %s1068_s21 }
  0x18   :  { %615 = vmatpush.bf16.msra.mxu2 %v1438_v23  ;;  %v1437_v27 = vld [vmem:[%s1965_s1 + $0x88] sm:$0xff]  ;;  %v1436_v32 = vld [vmem:[%s1965_s1 + $0x80] sm:$0xff]  ;;  %v1467_v35 = vld [vmem:[%s1965_s1 + $0x178] sm:$0xff]  ;;  %vm1027_vm4 = vcmask 1040384   ;;  %vm1031_vm5 = vcmask 1042434   ;;  %vm1035_vm6 = vcmask 1041408  }
  0x19   :  { %628 = vmatpush.bf16.msra.mxu3 %v1446_v24  ;;  %v1445_v28 = vld [vmem:[%s1965_s1 + $0xc8] sm:$0xff]  ;;  %v1444_v33 = vld [vmem:[%s1965_s1 + $0xc0] sm:$0xff]  ;;  %v46_v36 = vld.sshfl [vmem:[#allocation1 + $0x10] sm:$0xff pattern:$0x73625140]  ;;  %vm1037_vm7 = vcmask 1044484  }
  0x1a   :  { %v38_v29 = vld [vmem:[%s1964_s0 + $0x8] sm:$0xff]  ;;  %590 = vmatpush.bf16.msra.mxu0 %v1421_v25  ;;  %v44_v37 = vld.sshfl [vmem:[#allocation1] sm:$0xff pattern:$0x73625140]  ;;  %v1475_v40 = vld [vmem:[%s1965_s1 + $0x1b8] sm:$0xff]  ;;  %v62_v42 = vpack.c.bf16 %v46_v36, %v46_v36  ;;  %vm1041_vm8 = vcmask 1046534  }
  0x1b   :  { %43 = vst [vmem:[#allocation1 + $0x20] ss:$4 sm:$0xff] %v38_v29  ;;  %603 = vmatpush.bf16.msra.mxu1 %v1429_v26  ;;  %v47_v38 = vld.sshfl [vmem:[#allocation1 + $0x18] sm:$0xff pattern:$0x73625140]  ;;  %v60_v43 = vpack.c.bf16 %v44_v37, %v44_v37  ;;  %v1458_v46 = vld [vmem:[%s1965_s1 + $0x130] sm:$0xff] }
  0x1c   :  { %616 = vmatpush.bf16.msra.mxu2 %v1437_v27  ;;  %v45_v39 = vld.sshfl [vmem:[#allocation1 + $0x8] sm:$0xff pattern:$0x73625140]  ;;  %v1483_v41 = vld [vmem:[%s1965_s1 + $0x1f8] sm:$0xff]  ;;  %v63_v44 = vpack.c.bf16 %v47_v38, %v47_v38  ;;  %v1466_v47 = vld [vmem:[%s1965_s1 + $0x170] sm:$0xff]  ;;  %vm1045_vm9 = vcmask 1045508  }
  0x1d   :  { %629 = vmatpush.bf16.msra.mxu3 %v1445_v28  ;;  %v61_v45 = vpack.c.bf16 %v45_v39, %v45_v39  ;;  %v1474_v48 = vld [vmem:[%s1965_s1 + $0x1b0] sm:$0xff]  ;;  %v1457_v50 = vld [vmem:[%s1965_s1 + $0x128] sm:$0xff]  ;;  %v1456_v54 = vld [vmem:[%s1965_s1 + $0x120] sm:$0xff]  ;;  %s1057_s26 = sshll.u32 %s1973_s9, 4  ;;  %s1058_s26 = int_to_ptr.hbm [resolvable:$true] %s1057_s26 }
  0x1e   :  { %591 = vmatpush.bf16.msra.mxu0 %v1420_v30  ;;  %v1482_v49 = vld [vmem:[%s1965_s1 + $0x1f0] sm:$0xff]  ;;  %v1465_v51 = vld [vmem:[%s1965_s1 + $0x168] sm:$0xff]  ;;  %v1464_v55 = vld [vmem:[%s1965_s1 + $0x160] sm:$0xff] }
  0x1f   :  { %604 = vmatpush.bf16.msra.mxu1 %v1428_v31  ;;  %v1473_v52 = vld [vmem:[%s1965_s1 + $0x1a8] sm:$0xff]  ;;  %v1472_v56 = vld [vmem:[%s1965_s1 + $0x1a0] sm:$0xff]  ;;  %v1455_v58 = vld [vmem:[%s1965_s1 + $0x118] sm:$0xff] }
  0x20   :  { %617 = vmatpush.bf16.msra.mxu2 %v1436_v32  ;;  %v1481_v53 = vld [vmem:[%s1965_s1 + $0x1e8] sm:$0xff]  ;;  %v1480_v57 = vld [vmem:[%s1965_s1 + $0x1e0] sm:$0xff]  ;;  %v1463_v59 = vld [vmem:[%s1965_s1 + $0x158] sm:$0xff] }
  0x21   :  { %630 = vmatpush.bf16.msra.mxu3 %v1444_v33  ;;  %592 = vmatmul.bf16.vlgmr.msra.gmra.mxu0 %v60_v43  ;;  %v1471_v60 = vld [vmem:[%s1965_s1 + $0x198] sm:$0xff]  ;;  %v1454_v62 = vld [vmem:[%s1965_s1 + $0x110] sm:$0xff]  ;;  %v1453_v2 = vld [vmem:[%s1965_s1 + $0x108] sm:$0xff] }
  0x22   :  { %636 = vmatpush.bf16.msrb.mxu0 %v1459_v34  ;;  %605 = vmatmul.bf16.vlgmr.msra.gmra.mxu1 %v61_v45  ;;  %v1479_v61 = vld [vmem:[%s1965_s1 + $0x1d8] sm:$0xff]  ;;  %v1462_v63 = vld [vmem:[%s1965_s1 + $0x150] sm:$0xff]  ;;  %v1461_v3 = vld [vmem:[%s1965_s1 + $0x148] sm:$0xff] }
  0x23   :  { %649 = vmatpush.bf16.msrb.mxu1 %v1467_v35  ;;  %618 = vmatmul.bf16.vlgmr.msra.gmra.mxu2 %v62_v42  ;;  %v1470_v0 = vld [vmem:[%s1965_s1 + $0x190] sm:$0xff]  ;;  %v1469_v4 = vld [vmem:[%s1965_s1 + $0x188] sm:$0xff]  ;;  %v1452_v6 = vld [vmem:[%s1965_s1 + $0x100] sm:$0xff] }
  0x24   :  { %662 = vmatpush.bf16.msrb.mxu2 %v1475_v40  ;;  %631 = vmatmul.bf16.vlgmr.msra.gmra.mxu3 %v63_v44  ;;  %v1478_v1 = vld [vmem:[%s1965_s1 + $0x1d0] sm:$0xff]  ;;  %v1477_v5 = vld [vmem:[%s1965_s1 + $0x1c8] sm:$0xff]  ;;  %v1460_v7 = vld [vmem:[%s1965_s1 + $0x140] sm:$0xff] }
  0x25   :  { %675 = vmatpush.bf16.msrb.mxu3 %v1483_v41  ;;  %v1468_v8 = vld [vmem:[%s1965_s1 + $0x180] sm:$0xff]  ;;  %v49_v11 = vld.sshfl [vmem:[#allocation1 + $0x28] sm:$0xff pattern:$0x73625140] }
  0x26   :  { %637 = vmatpush.bf16.msrb.mxu0 %v1458_v46  ;;  %v1476_v9 = vld [vmem:[%s1965_s1 + $0x1c0] sm:$0xff]  ;;  %v50_v12 = vld.sshfl [vmem:[#allocation1 + $0x30] sm:$0xff pattern:$0x73625140]  ;;  %v65_v15 = vpack.c.bf16 %v49_v11, %v49_v11  ;;  %v1485_v18 = vld [vmem:[%s1967_s3 + $0x8] sm:$0xff] }
  0x27   :  { %650 = vmatpush.bf16.msrb.mxu1 %v1466_v47  ;;  %v48_v10 = vld.sshfl [vmem:[#allocation1 + $0x20] sm:$0xff pattern:$0x73625140]  ;;  %v51_v13 = vld.sshfl [vmem:[#allocation1 + $0x38] sm:$0xff pattern:$0x73625140]  ;;  %v66_v16 = vpack.c.bf16 %v50_v12, %v50_v12 }
  0x28   :  { %663 = vmatpush.bf16.msrb.mxu2 %v1474_v48  ;;  %v64_v14 = vpack.c.bf16 %v48_v10, %v48_v10  ;;  %v67_v17 = vpack.c.bf16 %v51_v13, %v51_v13  ;;  %v1484_v24 = vld [vmem:[%s1967_s3] sm:$0xff]  ;;  %v1491_v10 = vld [vmem:[%s1971_s7 + $0x24] sm:$0xf0]  ;;  %v1487_v11 = vld [vmem:[%s1971_s7 + $0xc] sm:$0xf] }
  0x29   :  { %676 = vmatpush.bf16.msrb.mxu3 %v1482_v49  ;;  %v1504_v26 = vld [vmem:[%s1966_s2] ss:$0 sm:$0xff]  ;;  %v1360_v13 = vld [vmem:[%s1971_s7 + $0x28] sm:$0xf0] }
  0x2a   :  { %638 = vmatpush.bf16.msrb.mxu0 %v1457_v50  ;;  %v731_v27 = vld [vmem:[%s1969_s5] sm:$0xf] }
  0x2b   :  { %651 = vmatpush.bf16.msrb.mxu1 %v1465_v51  ;;  %v742_v29 = vsel %vm740_vm0, %v731_v27, 0  ;;  %v1382_v49 = vld [vmem:[%s1971_s7 + $0x40] sm:$0xf]  ;;  %v1494_v51 = vld [vmem:[%s1971_s7 + $0x44] sm:$0xf] }
  0x2c   :  { %664 = vmatpush.bf16.msrb.mxu2 %v1473_v52  ;;  %v1498_v50 = vld [vmem:[%s1971_s7 + $0x5c] sm:$0xf0] }
  0x2d   :  { %677 = vmatpush.bf16.msrb.mxu3 %v1481_v53  ;;  %v1383_v52 = vor.u32 %v1498_v50, %v1382_v49  ;;  %v1384_v53 = vld [vmem:[%s1971_s7 + $0x60] sm:$0xf0] }
  0x2e   :  { %639 = vmatpush.bf16.msrb.mxu0 %v1456_v54  ;;  %v1390_v54 = vld [vmem:[%s1971_s7 + $0x48] sm:$0xf] }
  0x2f   :  { %652 = vmatpush.bf16.msrb.mxu1 %v1464_v55  ;;  %v1499_v55 = vld [vmem:[%s1971_s7 + $0x64] sm:$0xf0] }
  0x30   :  { %665 = vmatpush.bf16.msrb.mxu2 %v1472_v56  ;;  %v1387_v56 = vor.u32 %v1494_v51, %v1384_v53 }
  0x31   :  { %678 = vmatpush.bf16.msrb.mxu3 %v1480_v57  ;;  %v1391_v57 = vor.u32 %v1499_v55, %v1390_v54 }
  0x32   :  { %640 = vmatpush.bf16.msrb.mxu0 %v1455_v58  ;;  %v1495_v58 = vld [vmem:[%s1971_s7 + $0x4c] sm:$0xf] }
  0x33   :  { %653 = vmatpush.bf16.msrb.mxu1 %v1463_v59  ;;  %v1392_v59 = vld [vmem:[%s1971_s7 + $0x68] sm:$0xf0] }
  0x34   :  { %666 = vmatpush.bf16.msrb.mxu2 %v1471_v60  ;;  %v1350_v60 = vld [vmem:[%s1971_s7] sm:$0xf] }
  0x35   :  { %679 = vmatpush.bf16.msrb.mxu3 %v1479_v61  ;;  %v1395_v61 = vor.u32 %v1495_v58, %v1392_v59 }
  0x36   :  { %641 = vmatpush.bf16.msrb.mxu0 %v1454_v62  ;;  %v1490_v62 = vld [vmem:[%s1971_s7 + $0x1c] sm:$0xf0] }
  0x37   :  { %654 = vmatpush.bf16.msrb.mxu1 %v1462_v63  ;;  %v1486_v63 = vld [vmem:[%s1971_s7 + $0x4] sm:$0xf] }
  0x38   :  { %667 = vmatpush.bf16.msrb.mxu2 %v1470_v0  ;;  %v1352_v0 = vld [vmem:[%s1971_s7 + $0x20] sm:$0xf0] }
  0x39   :  { %680 = vmatpush.bf16.msrb.mxu3 %v1478_v1  ;;  %v1351_v1 = vor.u32 %v1490_v62, %v1350_v60 }
  0x3a   :  { %642 = vmatpush.bf16.msrb.mxu0 %v1453_v2  ;;  %v1355_v2 = vor.u32 %v1486_v63, %v1352_v0 }
  0x3b   :  { %655 = vmatpush.bf16.msrb.mxu1 %v1461_v3  ;;  %v1505_v3 = vld [vmem:[%s1968_s4] ss:$0 sm:$0xff] }
  0x3c   :  { %668 = vmatpush.bf16.msrb.mxu2 %v1469_v4 }
  0x3d   :  { %681 = vmatpush.bf16.msrb.mxu3 %v1477_v5 }
  0x3e   :  { %643 = vmatpush.bf16.msrb.mxu0 %v1452_v6 }
  0x3f   :  { %656 = vmatpush.bf16.msrb.mxu1 %v1460_v7 }
  0x40   :  { %669 = vmatpush.bf16.msrb.mxu2 %v1468_v8 }
  0x41   :  { %682 = vmatpush.bf16.msrb.mxu3 %v1476_v9  ;;  %644 = vmatmul.bf16.vlgmr.msrb.gmra.mxu0 %v64_v14  ;;  %v1358_v9 = vld [vmem:[%s1971_s7 + $0x8] sm:$0xf]  ;;  %v1363_v14 = vor.u32 %v1487_v11, %v1360_v13 }
  0x42   :  { %657 = vmatmul.bf16.vlgmr.msrb.gmra.mxu1 %v65_v15  ;;  %720 = vmatpush.bf16.msra.mxu0 %v1485_v18  ;;  %v1359_v12 = vor.u32 %v1491_v10, %v1358_v9  ;;  %v1398_v15 = vld [vmem:[%s1971_s7 + $0x50] sm:$0xf] }
  0x43   :  { %670 = vmatmul.bf16.vlgmr.msrb.gmra.mxu2 %v66_v16  ;;  %751 = vmatpush.bf16.msra.mxu1 %v742_v29  ;;  %v1500_v16 = vld [vmem:[%s1971_s7 + $0x6c] sm:$0xf0]  ;;  %v1488_v29 = vld [vmem:[%s1971_s7 + $0x14] sm:$0xf] }
  0x44   :  { %683 = vmatmul.bf16.vlgmr.msrb.gmra.mxu3 %v67_v17  ;;  %882 = vmatpush.bf16.msra.mxu2 %v1383_v52  ;;  %v1496_v17 = vld [vmem:[%s1971_s7 + $0x54] sm:$0xf]  ;;  %v1399_v18 = vor.u32 %v1500_v16, %v1398_v15 }
  0x45   :  { %895 = vmatpush.bf16.msra.mxu3 %v1387_v56 }
  0x46   :  { %721 = vmatpush.bf16.msra.mxu0 %v1484_v24  ;;  %v1497_v24 = vld [vmem:[%s1971_s7 + $0x5c] sm:$0xf] }
  0x47   :  { %921 = vmatpush.bf16.msrb.mxu1 %v1395_v61 }
  0x48   :  { %883 = vmatpush.bf16.msra.mxu2 %v1351_v1 }
  0x49   :  { %896 = vmatpush.bf16.msra.mxu3 %v1355_v2 }
  0x4a   :  { %908 = vmatpush.bf16.msrb.mxu0 %v1391_v57 }
  0x4b   :  { %922 = vmatpush.bf16.msrb.mxu1 %v1363_v14 }
  0x4c   :  { %934 = vmatpush.bf16.msrb.mxu2 %v1399_v18 }
  0x4e   :  { %909 = vmatpush.bf16.msrb.mxu0 %v1359_v12 }
  0x9e   :  { %v593_v19 = vpop.f32.mrf.mxu0 }
  0x9f   :  { %v606_v20 = vpop.f32.mrf.mxu1  ;;  %v594_v31 = vadd.f32 %v1504_v26, %v593_v19  ;;  %v1400_v19 = vld [vmem:[%s1971_s7 + $0x70] sm:$0xf0]  ;;  %v1366_v26 = vld [vmem:[%s1971_s7 + $0x10] sm:$0xf] }
  0xa1   :  { %v607_v32 = vadd.f32 %v606_v20, %v594_v31  ;;  %v1406_v20 = vld [vmem:[%s1971_s7 + $0x58] sm:$0xf] }
  0xa6   :  { %v619_v21 = vpop.f32.mrf.mxu2  ;;  %v595_v23 = vpop.f32.mrf.mxu0 }
  0xa7   :  { %v632_v22 = vpop.f32.mrf.mxu3  ;;  %v608_v25 = vpop.f32.mrf.mxu1  ;;  %v620_v33 = vadd.f32 %v619_v21, %v607_v32  ;;  %v1501_v21 = vld [vmem:[%s1971_s7 + $0x74] sm:$0xf0] }
  0xa8   :  { %v1407_v23 = vor.u32 %v1501_v21, %v1406_v20  ;;  %v1408_v25 = vld [vmem:[%s1971_s7 + $0x78] sm:$0xf0] }
  0xa9   :  { %v633_v34 = vadd.f32 %v632_v22, %v620_v33  ;;  %v1403_v22 = vor.u32 %v1496_v17, %v1400_v19  ;;  %v1411_v27 = vor.u32 %v1497_v24, %v1408_v25  ;;  %v1374_v33 = vld [vmem:[%s1971_s7 + $0x18] sm:$0xf] }
  0xab   :  { %947 = vmatpush.bf16.msrb.mxu3 %v1403_v22 }
  0xae   :  { %v621_v28 = vpop.f32.mrf.mxu2 }
  0xaf   :  { %v634_v30 = vpop.f32.mrf.mxu3  ;;  %v1492_v28 = vld [vmem:[%s1971_s7 + $0x2c] sm:$0xf0] }
  0xb0   :  { %v1368_v30 = vld [vmem:[%s1971_s7 + $0x30] sm:$0xf0]  ;;  %v1367_v31 = vor.u32 %v1492_v28, %v1366_v26 }
  0xb1   :  { %v1371_v32 = vor.u32 %v1488_v29, %v1368_v30 }
  0xb2   :  { %935 = vmatpush.bf16.msrb.mxu2 %v1367_v31 }
  0xb3   :  { %948 = vmatpush.bf16.msrb.mxu3 %v1371_v32 }
  0xbe   :  { %v645_v35 = vpop.f32.mrf.mxu0 }
  0xbf   :  { %v658_v36 = vpop.f32.mrf.mxu1  ;;  %v646_v37 = vadd.f32 %v645_v35, %v633_v34  ;;  %v1493_v34 = vld [vmem:[%s1971_s7 + $0x34] sm:$0xf0]  ;;  %v1489_v35 = vld [vmem:[%s1971_s7 + $0x1c] sm:$0xf] }
  0xc1   :  { %v659_v38 = vadd.f32 %v658_v36, %v646_v37  ;;  %v1375_v36 = vor.u32 %v1493_v34, %v1374_v33  ;;  %v1376_v37 = vld [vmem:[%s1971_s7 + $0x38] sm:$0xf0] }
  0xc6   :  { %v671_v39 = vpop.f32.mrf.mxu2  ;;  %v647_v42 = vpop.f32.mrf.mxu0 }
  0xc7   :  { %v684_v40 = vpop.f32.mrf.mxu3  ;;  %v672_v41 = vadd.f32 %v671_v39, %v659_v38  ;;  %v660_v43 = vpop.f32.mrf.mxu1  ;;  %v1379_v38 = vor.u32 %v1489_v35, %v1376_v37  ;;  %v1506_v39 = vld [vmem:[%s1970_s6] ss:$0 sm:$0xff]  ;;  %s1575_s6 = smov [#allocation4]  }
  0xc8   :  { %s1066_s7 = sshll.u32 %s1575_s6, 4  ;;  %s1067_s7 = int_to_ptr.vmem [resolvable:$true] %s1066_s7 }
  0xc9   :  { %v685_v44 = vadd.f32 %v684_v40, %v672_v41 }
  0xcb   :  { %v688_v45 = vmax.f32 %v685_v44, 0.0 }
  0xcd   :  { %v689_v46 = vpack.c.bf16 %v688_v45, %v688_v45  ;;  %v775_v45 = vld [vmem:[%s1972_s8] sm:$0xff]  ;;  %s1576_s8 = smov [#allocation2]  }
  0xce   :  { %v673_v47 = vpop.f32.mrf.mxu2  ;;  %v777_v49 = vperm.slane %v775_v45, 0  ;;  %v778_v50 = vperm.slane %v775_v45, 1  ;;  %v780_v51 = vperm.slane %v775_v45, 3  ;;  %v783_v2 = vperm.slane %v775_v45, 6  ;;  %s1055_s10 = sshll.u32 %s1576_s8, 4  ;;  %s1056_s10 = int_to_ptr.vmem [resolvable:$true] %s1055_s10 }
  0xcf   :  { %v686_v48 = vpop.f32.mrf.mxu3  ;;  %1346 = vmatmul.msk.bf16.vlgmr.msra.gmra.mxu0 %vm710_vm1, %v689_v46  ;;  %v782_v9 = vperm.slane %v775_v45, 5 }
  0xd0   :  { %960 = vmatpush.bf16.msra.mxu0 %v1407_v23  ;;  %v779_v48 = vperm.slane %v775_v45, 2 }
  0xd4   :  { %961 = vmatpush.bf16.msra.mxu0 %v1375_v36 }
 0x14c   :  { %v723_v4 = vpop.f32.mrf.mxu0 }
 0x14d   :  { %v724_v5 = vadd.f32 %v1505_v3, %v723_v4  ;;  %v784_v3 = vperm.slane %v775_v45, 7 }
 0x14f   :  { %v727_v6 = vmax.f32 %v724_v5, 0.0 }
 0x151   :  { %729 = vst.msk [vmem:[#allocation4] sm:$0x3] %vm728_vm2, %v727_v6  ;;  %v730_v7 = vpack.c.bf16 %v727_v6, %v727_v6 }
 0x152   :  { %1071 = dma.vmem_to_hbm [thread:$0]  %s1067_s7, 32, %s1069_s21, [#allocation5]  }
 0x153   :  { %1347 = vmatmul.msk.bf16.vlgmr.msra.gmra.mxu1 %vm736_vm3, %v730_v7 }
 0x154   :  { %v725_v8 = vpop.f32.mrf.mxu0  ;;  %973 = vmatpush.bf16.msra.mxu1 %v1411_v27 }
 0x155   :  { %v781_v8 = vperm.slane %v775_v45, 4 }
 0x158   :  { %974 = vmatpush.bf16.msra.mxu1 %v1379_v38 }
 0x1d0   :  { %v753_v40 = vpop.f32.mrf.mxu1 }
 0x1d1   :  { %v754_v41 = vadd.f32 %v1506_v39, %v753_v40 }
 0x1d3   :  { %v757_v42 = vmax.f32 %v754_v41, 0.0 }
 0x1d5   :  { %v758_v43 = vpack.c.bf16 %v757_v42, %v757_v42 }
 0x1d7   :  { %1412 = vmatmul.msk.bf16.vlgmr.msra.gmra.mxu2 %vm710_vm1, %v758_v43  ;;  %1413 = vmatmul.msk.bf16.vlgmr.msra.gmra.mxu3 %vm710_vm1, %v758_v43 }
 0x1d8   :  { %1414 = vmatmul.msk.bf16.vlgmr.msrb.gmra.mxu0 %vm710_vm1, %v758_v43  ;;  %1415 = vmatmul.msk.bf16.vlgmr.msrb.gmra.mxu1 %vm710_vm1, %v758_v43  ;;  %v755_v44 = vpop.f32.mrf.mxu1 }
 0x1e7   :  { %1416 = vmatmul.msk.bf16.vlgmr.msrb.gmra.mxu2 %vm710_vm1, %v758_v43  ;;  %1417 = vmatmul.msk.bf16.vlgmr.msrb.gmra.mxu3 %vm710_vm1, %v758_v43 }
 0x1e8   :  { %1418 = vmatmul.msk.bf16.vlgmr.msra.gmra.mxu0 %vm710_vm1, %v758_v43  ;;  %1419 = vmatmul.msk.bf16.vlgmr.msra.gmra.mxu1 %vm710_vm1, %v758_v43 }
 0x255   :  { %v911_v46 = vpop.f32.mrf.mxu0  ;;  %v924_v47 = vpop.f32.mrf.mxu1 }
 0x256   :  { %v912_v52 = vadd.f32 %v911_v46, %v779_v48  ;;  %v925_v57 = vadd.f32 %v924_v47, %v780_v51 }
 0x258   :  { %v982_v60 = vmul.f32 0.5, %v912_v52  ;;  %v983_v63 = vmul.f32 0.5, %v925_v57 }
 0x25a   :  { %v885_v53 = vpop.f32.mrf.mxu2  ;;  %v898_v54 = vpop.f32.mrf.mxu3  ;;  %1507 = vtanh.f32 %v982_v60 }
 0x25b   :  { %v886_v55 = vadd.f32 %v885_v53, %v777_v49  ;;  %v899_v56 = vadd.f32 %v898_v54, %v778_v50 }
 0x25d   :  { %v913_v58 = vpop.f32.mrf.mxu0  ;;  %v926_v59 = vpop.f32.mrf.mxu1  ;;  %v980_v61 = vmul.f32 0.5, %v886_v55  ;;  %v981_v62 = vmul.f32 0.5, %v899_v56 }
 0x25f   :  { %1509 = vtanh.f32 %v980_v61 }
 0x260   :  { %1511 = vtanh.f32 %v981_v62  ;;  %v1508_v10 = vpop.eup %1507 }
 0x261   :  { %1513 = vtanh.f32 %v983_v63  ;;  %v998_v26 = vadd.f32 1.0, %v1508_v10 }
 0x262   :  { %v887_v0 = vpop.f32.mrf.mxu2  ;;  %v900_v1 = vpop.f32.mrf.mxu3 }
 0x263   :  { %v1006_v33 = vmul.f32 0.5, %v998_v26 }
 0x265   :  { %v963_v4 = vpop.f32.mrf.mxu0  ;;  %v976_v5 = vpop.f32.mrf.mxu1 }
 0x266   :  { %v964_v6 = vadd.f32 %v963_v4, %v783_v2  ;;  %v977_v7 = vadd.f32 %v976_v5, %v784_v3  ;;  %v1510_v12 = vpop.eup %1509 }
 0x267   :  { %v1512_v14 = vpop.eup %1511  ;;  %v996_v20 = vadd.f32 1.0, %v1510_v12 }
 0x268   :  { %v986_v11 = vmul.f32 0.5, %v964_v6  ;;  %v987_v13 = vmul.f32 0.5, %v977_v7  ;;  %v1514_v17 = vpop.eup %1513  ;;  %v997_v21 = vadd.f32 1.0, %v1512_v14 }
 0x269   :  { %v999_v27 = vadd.f32 1.0, %v1514_v17  ;;  %v1004_v30 = vmul.f32 0.5, %v996_v20 }
 0x26a   :  { %1515 = vtanh.f32 %v986_v11  ;;  %v937_v15 = vpop.f32.mrf.mxu2  ;;  %v950_v16 = vpop.f32.mrf.mxu3  ;;  %v1005_v31 = vmul.f32 0.5, %v997_v21 }
 0x26b   :  { %1517 = vtanh.f32 %v987_v13  ;;  %v938_v18 = vadd.f32 %v937_v15, %v781_v8  ;;  %v951_v19 = vadd.f32 %v950_v16, %v782_v9  ;;  %v1007_v34 = vmul.f32 0.5, %v999_v27 }
 0x26c   :  { %v1012_v41 = vpack.c.bf16 %v1005_v31, %v1004_v30 }
 0x26d   :  { %v984_v22 = vmul.f32 0.5, %v938_v18  ;;  %v985_v23 = vmul.f32 0.5, %v951_v19  ;;  %v965_v24 = vpop.f32.mrf.mxu0  ;;  %v978_v25 = vpop.f32.mrf.mxu1  ;;  %v1013_v43 = vpack.c.bf16 %v1007_v34, %v1006_v33 }
 0x26e   :  { %v1020_v48 = vrot.slane %v1012_v41, 3 }
 0x26f   :  { %1519 = vtanh.f32 %v984_v22  ;;  %v1021_v50 = vrot.slane %v1013_v43, 6  ;;  %v1022_v51 = vrot.slane %v1013_v43, 1 }
 0x270   :  { %v1516_v28 = vpop.eup %1515  ;;  %1521 = vtanh.f32 %v985_v23  ;;  %v1030_v57 = vsel %vm1027_vm4, %v1012_v41, %v1020_v48 }
 0x271   :  { %v1518_v29 = vpop.eup %1517  ;;  %v1002_v32 = vadd.f32 1.0, %v1516_v28  ;;  %v1034_v58 = vsel %vm1031_vm5, %v1021_v50, %v1022_v51 }
 0x272   :  { %v1003_v35 = vadd.f32 1.0, %v1518_v29  ;;  %v939_v36 = vpop.f32.mrf.mxu2  ;;  %v952_v37 = vpop.f32.mrf.mxu3  ;;  %v1036_v61 = vsel %vm1035_vm6, %v1030_v57, %v1034_v58 }
 0x273   :  { %v1010_v38 = vmul.f32 0.5, %v1002_v32 }
 0x274   :  { %v1011_v39 = vmul.f32 0.5, %v1003_v35 }
 0x275   :  { %v1520_v40 = vpop.eup %1519 }
 0x276   :  { %v1522_v42 = vpop.eup %1521  ;;  %v1000_v44 = vadd.f32 1.0, %v1520_v40  ;;  %v1015_v45 = vpack.c.bf16 %v1011_v39, %v1010_v38 }
 0x277   :  { %v1001_v46 = vadd.f32 1.0, %v1522_v42 }
 0x278   :  { %v1008_v47 = vmul.f32 0.5, %v1000_v44  ;;  %v1025_v52 = vrot.slane %v1015_v45, 2  ;;  %v1026_v53 = vrot.slane %v1015_v45, 5 }
 0x279   :  { %v1009_v49 = vmul.f32 0.5, %v1001_v46 }
 0x27a   :  { %v1044_v60 = vsel %vm1041_vm8, %v1025_v52, %v1026_v53 }
 0x27b   :  { %v1014_v54 = vpack.c.bf16 %v1009_v49, %v1008_v47 }
 0x27d   :  { %v1023_v55 = vrot.slane %v1014_v54, 4  ;;  %v1024_v56 = vrot.slane %v1014_v54, 7 }
 0x27f   :  { %v1040_v59 = vsel %vm1037_vm7, %v1023_v55, %v1024_v56 }
 0x280   :  { %v1046_v62 = vsel %vm1045_vm9, %v1040_v59, %v1044_v60 }
 0x281   :  { %v1047_v63 = vsel %vm740_vm0, %v1036_v61, %v1046_v62 }
 0x282   :  { %1049 = vst [vmem:[#allocation2] sm:$0xff] %v1047_v63 }
 0x283   :  { %1060 = dma.vmem_to_hbm [thread:$0]  %s1056_s10, 128, %s1058_s26, [#allocation3]  }
 0x284   :  { %1571 = dma.done.wait [#allocation3], 128  }
 0x285   :  { %1572 = vsyncadd [#allocation3], 4294967168 }
 0x286   :  { %1573 = dma.done.wait [#allocation5], 32  }
 0x287   :  { %1574 = vsyncadd [#allocation5], 4294967264 }
 0x288   :  { %1080 = vsyncpa [#allocation3], 1 }
 0x289   :  { %1081 = vsyncpa [#allocation5], 1 }

</bundles_post_ra>
